<compile_context>
chip_gen: v5e
topology: v5e:2x2
jax: 0.10.0
libtpu: 0.0.40
codegen_flags: <defaults>
</compile_context>

<pallas_src>
import functools

import jax
import jax.numpy as jnp
from jax.experimental import pallas as pl
from jax.experimental.pallas import tpu as pltpu

_LANE_CHOICES = (1024, 512, 256, 128)        # widest lane-dense output wins
_MIN_GRID_STEPS = 4                          # let ("parallel",) feed both TCs on v7x
_BLOCK_BYTES = 8 * 1024 * 1024               # per-block VMEM; x4 buffers = 32 MiB
_V7X_SAFE_VMEM_LIMIT = 48 * 1024 * 1024      # fits v7x's 64 MiB physical VMEM
_BIG_VMEM_LIMIT = 96 * 1024 * 1024           # v5e / v6e have 128 MiB physical VMEM


def _add_one_kernel(x_ref, o_ref):
    # Elementwise hot path: +1 on the whole VMEM tile (VPU). ~1-2% of step time.
    o_ref[...] = x_ref[...] + jnp.asarray(1, dtype=o_ref.dtype)


@functools.lru_cache(maxsize=None)
def _vmem_limit_bytes() -> int:
    """Per-generation scoped-VMEM budget (conservative default = v7x-safe)."""
    try:
        phys = int(getattr(pltpu.get_tpu_info(), "vmem_capacity_bytes"))
    except Exception:  # any query failure -> v7x-safe value
        return _V7X_SAFE_VMEM_LIMIT
    return _BIG_VMEM_LIMIT if phys >= 128 * 1024 * 1024 else _V7X_SAFE_VMEM_LIMIT


def _sublane_for_dtype(dtype) -> int:
    """Packed-sublane granularity: f32->8, bf16/f16->16, int8/fp8->32."""
    itemsize = jnp.dtype(dtype).itemsize
    if itemsize >= 4:
        return 8
    if itemsize == 2:
        return 16
    return 32


def _pick_lane(n: int) -> int:
    """Widest lane count (multiple of 128) that divides n exactly."""
    for lane in _LANE_CHOICES:
        if n % lane == 0:
            return lane
    return 128  # unreachable: caller guarantees n % 128 == 0


def _pick_tile_rows(rows: int, lane: int, itemsize: int, sublane: int) -> int:
    """Largest ~_BLOCK_BYTES block, multiple of the packed sublane, with a
    minimum grid length so megacore sharding has work for both TensorCores."""
    if rows <= sublane:
        # Single block covering the full rows dim (block dim == full array dim
        # satisfies the (8,128) rule even when rows < 8).
        return rows
    target_rows = max(sublane, _BLOCK_BYTES // (lane * itemsize))
    tile = max(sublane, (target_rows // sublane) * sublane)
    # Cap so the 1-D grid has >= _MIN_GRID_STEPS steps (v7x 2-TC sharding).
    cap = -(-rows // _MIN_GRID_STEPS)                          # cdiv
    cap = max(sublane, ((cap + sublane - 1) // sublane) * sublane)
    return min(tile, cap)


def _run_add_one(slab: jax.Array, tile_rows: int) -> jax.Array:
    rows, lane = slab.shape
    grid = (pl.cdiv(rows, tile_rows),)  # ragged last row-block handled by Pallas
    return pl.pallas_call(
        _add_one_kernel,
        out_shape=jax.ShapeDtypeStruct((rows, lane), slab.dtype),
        grid_spec=pltpu.PrefetchScalarGridSpec(
            num_scalar_prefetch=0,
            grid=grid,
            in_specs=[pl.BlockSpec((tile_rows, lane), lambda i: (i, 0))],
            out_specs=pl.BlockSpec((tile_rows, lane), lambda i: (i, 0)),
        ),
        # No input_output_aliases: avoids XLA's defensive full-tensor copy and
        # preserves PyTorch semantics (fresh output, input untouched).
        compiler_params=pltpu.CompilerParams(
            dimension_semantics=("parallel",),      # 2-TC sharding on v7x
            vmem_limit_bytes=_vmem_limit_bytes(),
        ),
    )(slab)


def _tudui_forward_impl(x: jax.Array) -> jax.Array:
    """Pallas equivalent of Tudui.forward: returns x + 1, same shape."""
    # TODO(synk): PyTorch promotes bool + 1 to int64; JAX x64 is off, so we
    # promote to int32 instead (values are identical).
    if x.dtype == jnp.bool_:
        x = x.astype(jnp.int32)

    dtype = x.dtype
    orig_shape = x.shape
    itemsize = jnp.dtype(dtype).itemsize
    sublane = _sublane_for_dtype(dtype)
    n = x.size
    one = jnp.asarray(1, dtype=dtype)

    # Tiny-input or non-128-divisible fallback: a plain XLA elementwise add is
    # already HBM-optimal (1 read + 1 write).  Any pad/unpad or prefix+concat
    # plumbing around pallas_call would only add extra full-tensor HBM passes.
    if n < sublane * 128 or n % 128 != 0:
        return x + one

    # Fast path: lane-dense slab, reshape is metadata-only under jit (no pad).
    lane = _pick_lane(n)
    rows = n // lane
    slab = x.reshape(rows, lane)
    tile_rows = _pick_tile_rows(rows, lane, itemsize, sublane)
    out_slab = _run_add_one(slab, tile_rows)
    return out_slab.reshape(orig_shape)


# jit so the fast-path reshapes fuse / become bitcasts around the custom call.
tudui_forward = jax.jit(_tudui_forward_impl)


if __name__ == "__main__":
    key = jax.random.PRNGKey(0)
    k1, k2, k3 = jax.random.split(key, 3)

    # Module-consistent small input: (2,4,16,16) f32 = 2048 elems -> Pallas path.
    x = jax.random.normal(k1, (2, 4, 16, 16), dtype=jnp.float32)
    y = tudui_forward(x)
    jax.block_until_ready(y)
    assert y.shape == x.shape and y.dtype == x.dtype
    assert jnp.array_equal(y, x + 1.0)

    # 1 MiB f32 slab -> multi-step grid (tests block sizing + megacore cap).
    xl = jax.random.normal(k2, (256, 1024), dtype=jnp.float32)
    yl = tudui_forward(xl)
    jax.block_until_ready(yl)
    assert jnp.array_equal(yl, xl + 1.0)

    # bf16 input (exercises 16-row sublane packing on the Pallas path).
    xb = jax.random.normal(k3, (8, 32, 128), dtype=jnp.bfloat16)
    yb = tudui_forward(xb)
    jax.block_until_ready(yb)
    assert yb.dtype == jnp.bfloat16
    assert jnp.array_equal(yb, xb + jnp.asarray(1, jnp.bfloat16))

    # Awkward, non-128-divisible size (optimal plain-XLA fallback, no pad/unpad).
    xo = jax.random.normal(k1, (3, 5, 7), dtype=jnp.float32)
    yo = tudui_forward(xo)
    jax.block_until_ready(yo)
    assert jnp.array_equal(yo, xo + 1.0)

    # Scalar-style usage from the original script (x = 1.0).
    x_scalar = jnp.array([1.0], dtype=jnp.float32)
    y_scalar = tudui_forward(x_scalar)
    jax.block_until_ready(y_scalar)
    assert jnp.array_equal(y_scalar, jnp.array([2.0], dtype=jnp.float32))

    # bool input: promoted before the kernel (PyTorch: bool + 1 -> int tensor).
    xbool = jax.random.uniform(k2, (2, 4, 16, 16)) > 0.5
    ybool = tudui_forward(xbool)
    jax.block_until_ready(ybool)
    assert ybool.dtype == jnp.int32
    assert jnp.array_equal(ybool, xbool.astype(jnp.int32) + 1)

    print("KERNEL_OK")
</pallas_src>

<mosaic_0001>
module attributes {stable_mosaic.version = 11 : i64} {
  func.func @_add_one_kernel(%arg0: i32, %arg1: memref<2x1024xf32, #tpu.memory_space<vmem>>, %arg2: memref<2x1024xf32, #tpu.memory_space<vmem>>) attributes {dimension_semantics = [#tpu.dimension_semantics<parallel>], iteration_bounds = array<i64: 1>, scalar_prefetch = 0 : i64, scratch_operands = 0 : i64, tpu.core_type = #tpu.core_type<tc>, window_params = [{transform_indices = @transform_0, window_bounds = array<i64: 2, 1024>}, {transform_indices = @transform_1, window_bounds = array<i64: 2, 1024>}]} {
    %c0 = arith.constant 0 : index
    %c0_0 = arith.constant 0 : index
    %0 = vector.load %arg1[%c0, %c0_0] : memref<2x1024xf32, #tpu.memory_space<vmem>>, vector<2x1024xf32>
    %cst = arith.constant 1.000000e+00 : f32
    %1 = vector.broadcast %cst : f32 to vector<2x1024xf32>
    %2 = arith.addf %0, %1 : vector<2x1024xf32>
    %c0_1 = arith.constant 0 : index
    %c0_2 = arith.constant 0 : index
    %3 = vector.load %arg2[%c0_1, %c0_2] : memref<2x1024xf32, #tpu.memory_space<vmem>>, vector<2x1024xf32>
    tpu.vector_store %arg2[%c0_1, %c0_2], %2 {strides = array<i32>} : memref<2x1024xf32, #tpu.memory_space<vmem>>, vector<2x1024xf32>,
    return
  }
  func.func @transform_0(%arg0: i32) -> (i32, i32) {
    %c0_i32 = arith.constant 0 : i32
    %c0_i32_0 = arith.constant 0 : i32
    return %arg0, %c0_i32 : i32, i32
  }
  func.func @transform_1(%arg0: i32) -> (i32, i32) {
    %c0_i32 = arith.constant 0 : i32
    %c0_i32_0 = arith.constant 0 : i32
    return %arg0, %c0_i32 : i32, i32
  }
}

</mosaic_0001>

<bundles_post_ra>
// kernel: _tudui_forward_impl.1
= control target key start
LH: loop header
LB: loop body
LE: loop exit
PB: predicated region body
PF: predicated region fallthrough
CT: control target
= control target key end

     0   :  { %s40_s0 = inlined_call_operand.vmem [shape: f32[2,1024], index: 0, kind: input, shape index: {}]   ;;  %s41_s1 = inlined_call_operand.vmem [shape: f32[2,1024], index: 1, kind: output, shape index: {}]  }
   0x1   :  { %v8_v0 = vld [vmem:[%s40_s0] sm:$0xff]  ;;  %v9_v1 = vld [vmem:[%s40_s0 + $0x8] sm:$0xff] }
   0x2   :  { %v10_v2 = vadd.f32 1.0, %v8_v0  ;;  %v11_v3 = vadd.f32 1.0, %v9_v1 }
   0x4   :  { %12 = vst [vmem:[%s41_s1] sm:$0xff] %v10_v2 }
   0x5   :  { %13 = vst [vmem:[%s41_s1 + $0x8] sm:$0xff] %v11_v3 }

</bundles_post_ra>
